<compile_context>
chip_gen: v7x
topology: tpu7x:2x2x1
jax: 0.10.0
libtpu: 0.0.40
codegen_flags: <defaults>
</compile_context>

<pallas_src>
import jax
import jax.numpy as jnp
from jax import lax
from jax.experimental import pallas as pl
from jax.experimental.pallas import tpu as pltpu


def _round_up(x, m):
    return (x + m - 1) // m * m


def _make_qnet_kernel(tile_b, dsp, input_dim):
    D = input_dim

    def kernel(idx_ref, wef_ref, bf_ref, w2_ref, b2_ref, o_ref):
        # idx_ref : VMEM (tile_b, D) int32  flat one-hot column per (row, d); -1 = no hit
        # wef_ref : VMEM (DSP, HP)          fused We @ W1, zero-padded (resident)
        # bf_ref  : VMEM (1, HP)   f32      fused be @ W1 + b1 (resident)
        # w2_ref  : VMEM (HP, OP)           fc2 weight, zero-padded (resident)
        # b2_ref  : VMEM (1, OP)   f32      fc2 bias, zero-padded (resident)
        # o_ref   : VMEM (tile_b, OP) f32   lane-dense output tile
        wdt = wef_ref.dtype

        # One-hot built in-register: D lane-broadcast compares against a
        # column iota (VPU work), one cast, then straight onto the MXU.
        col = lax.broadcasted_iota(jnp.int32, (tile_b, dsp), 1)
        hit = col == idx_ref[:, 0:1]
        for d in range(1, D):
            hit = jnp.logical_or(hit, col == idx_ref[:, d:d + 1])
        onehot = hit.astype(wdt)

        # embedding+fc1 (fused weight) -> ReLU, h1 kept in registers.
        h1 = jnp.maximum(
            jnp.dot(onehot, wef_ref[...], preferred_element_type=jnp.float32)
            + bf_ref[...],
            0.0,
        )
        # fc2: second MXU pass, unmasked lane-dense (tile_b, OP) store.
        o_ref[...] = (
            jnp.dot(h1.astype(wdt), w2_ref[...], preferred_element_type=jnp.float32)
            + b2_ref[...]
        )

    return kernel


def prepare_qnet_params(params, *, state_size, input_dim, param_dtype=jnp.float32):
    """One-time parameter preprocessing: fuse embedding+fc1 and pad to lane-dense slabs."""
    we, be, w1, b1, w2, b2 = params          # (D*S,E), (1,E), (E,H), (1,H), (H,O), (1,O)
    D, S = input_dim, state_size
    DS = D * S
    assert we.shape[0] == DS
    H = w1.shape[1]
    O = w2.shape[1]

    wef = we.astype(jnp.float32) @ w1.astype(jnp.float32)                       # (D*S, H)
    bf = be.astype(jnp.float32) @ w1.astype(jnp.float32) + b1.astype(jnp.float32)  # (1, H)

    DSP = _round_up(DS, 128)                 # lane-dense one-hot / K dim
    HP = _round_up(H, 128)                   # lane-dense hidden
    OP = _round_up(O, 128)                   # lane-dense output slab

    wef_p = jnp.zeros((DSP, HP), param_dtype).at[:DS, :H].set(wef.astype(param_dtype))
    bf_p = jnp.zeros((1, HP), jnp.float32).at[:, :H].set(bf)
    w2_p = jnp.zeros((HP, OP), param_dtype).at[:H, :O].set(w2.astype(param_dtype))
    b2_p = jnp.zeros((1, OP), jnp.float32).at[:, :O].set(b2.astype(jnp.float32))

    return dict(
        wef=wef_p, bf=bf_p, w2=w2_p, b2=b2_p,
        state_size=S, input_dim=D, out_dim=O, dsp=DSP, hp=HP, op=OP,
    )


def qnet_forward(x_idx, prepared, *, tile_b=None):
    """x_idx: (B, input_dim) int indices in [0, state_size). Returns (B, O) f32."""
    B, D = x_idx.shape
    S = prepared["state_size"]
    assert D == prepared["input_dim"]
    O = prepared["out_dim"]
    DSP, HP, OP = prepared["dsp"], prepared["hp"], prepared["op"]

    if tile_b is None:
        # Large tiles amortize per-grid-step overhead (~0.35us) and fill MXU
        # rows; cap at round_up(B, 8) so tiny batches don't do wasted work.
        # (For large batches the grid has many steps -> shards across v7x TCs.)
        tile_b = min(256, _round_up(B, 8))
    assert tile_b % 8 == 0, "tile_b must be a multiple of the f32 sublane count (8)"
    B_pad = _round_up(max(B, tile_b), tile_b)

    # Flat one-hot column per (row, d): d*S + idx. Out-of-range indices -> -1
    # (row of zeros in the one-hot, matching jax.nn.one_hot OOB semantics).
    idx = x_idx.astype(jnp.int32)
    valid = (idx >= 0) & (idx < S)
    offs = (jnp.arange(D, dtype=jnp.int32) * S)[None, :]
    flat = jnp.where(valid, idx + offs, -1)
    flat_p = jnp.full((B_pad, D), -1, jnp.int32).at[:B].set(flat)

    grid = (B_pad // tile_b,)

    out_p = pl.pallas_call(
        _make_qnet_kernel(tile_b, DSP, D),
        out_shape=jax.ShapeDtypeStruct((B_pad, OP), jnp.float32),
        grid_spec=pltpu.PrefetchScalarGridSpec(
            num_scalar_prefetch=0,
            grid=grid,
            in_specs=[
                pl.BlockSpec((tile_b, D), lambda i: (i, 0)),   # per-tile indices
                pl.BlockSpec((DSP, HP), lambda i: (0, 0)),     # We@W1, resident
                pl.BlockSpec((1, HP), lambda i: (0, 0)),       # fused bias
                pl.BlockSpec((HP, OP), lambda i: (0, 0)),      # fc2 weight
                pl.BlockSpec((1, OP), lambda i: (0, 0)),       # fc2 bias
            ],
            out_specs=pl.BlockSpec((tile_b, OP), lambda i: (i, 0)),
        ),
        compiler_params=pltpu.CompilerParams(
            dimension_semantics=("parallel",)),
    )(flat_p, prepared["wef"], prepared["bf"], prepared["w2"], prepared["b2"])

    return out_p[:B, :O]


def init_linear(key, fan_in, fan_out):
    """PyTorch nn.Linear default init: U(-1/sqrt(fan_in), 1/sqrt(fan_in))."""
    kw, kb = jax.random.split(key)
    bound = 1.0 / jnp.sqrt(fan_in)
    # Stored pre-transposed as (in, out) so the math is x @ W + b.
    w = jax.random.uniform(kw, (fan_in, fan_out), jnp.float32, -bound, bound)
    b = jax.random.uniform(kb, (1, fan_out), jnp.float32, -bound, bound)
    return w, b


def reference_forward(x_idx, params, *, state_size):
    we, be, w1, b1, w2, b2 = params
    B, _ = x_idx.shape
    onehot = jax.nn.one_hot(x_idx, state_size, dtype=jnp.float32).reshape(B, -1)
    h0 = onehot @ we + be
    h1 = jax.nn.relu(h0 @ w1 + b1)
    return h1 @ w2 + b2


if __name__ == "__main__":
    # Small shapes consistent with the module.
    batch = 2
    input_dim = 4
    state_size = 8
    embedding_size = 32
    hidden_dim = 32
    output_dim = 4

    key = jax.random.PRNGKey(0)
    k_emb, k_fc1, k_fc2, k_x = jax.random.split(key, 4)

    we, be = init_linear(k_emb, input_dim * state_size, embedding_size)
    w1, b1 = init_linear(k_fc1, embedding_size, hidden_dim)
    w2, b2 = init_linear(k_fc2, hidden_dim, output_dim)
    params = (we, be, w1, b1, w2, b2)

    # One-time param fusion + padding (hoisted out of the per-call path).
    prepared = prepare_qnet_params(params, state_size=state_size, input_dim=input_dim)

    # Integer state indices, like LongTensor(x) in the PyTorch module.
    x_idx = jax.random.randint(k_x, (batch, input_dim), 0, state_size, dtype=jnp.int32)

    out = qnet_forward(x_idx, prepared)
    out = jax.block_until_ready(out)

    ref = reference_forward(x_idx, params, state_size=state_size)
    assert out.shape == (batch, output_dim)
    # Note: fusing We@W1 reassociates fp ops; stays well within 1e-5 at f32.
    assert jnp.allclose(out, ref, atol=1e-5, rtol=1e-5), (out, ref)

    print("KERNEL_OK")
</pallas_src>

<mosaic_0001>
module attributes {stable_mosaic.version = 11 : i64} {
  func.func @kernel(%arg0: i32, %arg1: memref<8x4xi32, #tpu.memory_space<vmem>>, %arg2: memref<128x128xf32, #tpu.memory_space<vmem>>, %arg3: memref<1x128xf32, #tpu.memory_space<vmem>>, %arg4: memref<128x128xf32, #tpu.memory_space<vmem>>, %arg5: memref<1x128xf32, #tpu.memory_space<vmem>>, %arg6: memref<8x128xf32, #tpu.memory_space<vmem>>) attributes {dimension_semantics = [#tpu.dimension_semantics<parallel>], iteration_bounds = array<i64: 1>, scalar_prefetch = 0 : i64, scratch_operands = 0 : i64, tpu.core_type = #tpu.core_type<tc>, window_params = [{transform_indices = @transform_0, window_bounds = array<i64: 8, 4>}, {pipeline_mode = #tpu.pipeline_mode<synchronous>, transform_indices = @transform_1, window_bounds = array<i64: 128, 128>}, {pipeline_mode = #tpu.pipeline_mode<synchronous>, transform_indices = @transform_2, window_bounds = array<i64: 1, 128>}, {pipeline_mode = #tpu.pipeline_mode<synchronous>, transform_indices = @transform_3, window_bounds = array<i64: 128, 128>}, {pipeline_mode = #tpu.pipeline_mode<synchronous>, transform_indices = @transform_4, window_bounds = array<i64: 1, 128>}, {transform_indices = @transform_5, window_bounds = array<i64: 8, 128>}]} {
    %0 = tpu.iota {dimensions = array<i32: 1>} : vector<8x128xi32>
    %c0 = arith.constant 0 : index
    %c0_0 = arith.constant 0 : index
    %1 = vector.load %arg1[%c0, %c0_0] : memref<8x4xi32, #tpu.memory_space<vmem>>, vector<8x1xi32>
    %2 = vector.broadcast %1 : vector<8x1xi32> to vector<8x128xi32>
    %3 = arith.cmpi eq, %0, %2 : vector<8x128xi32>
    %c0_1 = arith.constant 0 : index
    %c1 = arith.constant 1 : index
    %4 = vector.load %arg1[%c0_1, %c1] : memref<8x4xi32, #tpu.memory_space<vmem>>, vector<8x1xi32>
    %5 = vector.broadcast %4 : vector<8x1xi32> to vector<8x128xi32>
    %6 = arith.cmpi eq, %0, %5 : vector<8x128xi32>
    %7 = arith.ori %3, %6 : vector<8x128xi1>
    %c0_2 = arith.constant 0 : index
    %c2 = arith.constant 2 : index
    %8 = vector.load %arg1[%c0_2, %c2] : memref<8x4xi32, #tpu.memory_space<vmem>>, vector<8x1xi32>
    %9 = vector.broadcast %8 : vector<8x1xi32> to vector<8x128xi32>
    %10 = arith.cmpi eq, %0, %9 : vector<8x128xi32>
    %11 = arith.ori %7, %10 : vector<8x128xi1>
    %c0_3 = arith.constant 0 : index
    %c3 = arith.constant 3 : index
    %12 = vector.load %arg1[%c0_3, %c3] : memref<8x4xi32, #tpu.memory_space<vmem>>, vector<8x1xi32>
    %13 = vector.broadcast %12 : vector<8x1xi32> to vector<8x128xi32>
    %14 = arith.cmpi eq, %0, %13 : vector<8x128xi32>
    %15 = arith.ori %11, %14 : vector<8x128xi1>
    %16 = arith.extui %15 : vector<8x128xi1> to vector<8x128xi32>
    %17 = arith.sitofp %16 : vector<8x128xi32> to vector<8x128xf32>
    %c0_4 = arith.constant 0 : index
    %c0_5 = arith.constant 0 : index
    %18 = vector.load %arg2[%c0_4, %c0_5] : memref<128x128xf32, #tpu.memory_space<vmem>>, vector<128x128xf32>
    %cst = arith.constant dense<0.000000e+00> : vector<8x128xf32>
    %19 = tpu.matmul %17, %18, %cst {dimension_numbers = #tpu.dot_dimension_numbers<[1], [0], [0], [1], [0, 0, 1, 1], [], []>} : vector<8x128xf32>, vector<128x128xf32>, vector<8x128xf32> -> vector<8x128xf32>
    %c0_6 = arith.constant 0 : index
    %c0_7 = arith.constant 0 : index
    %20 = vector.load %arg3[%c0_6, %c0_7] : memref<1x128xf32, #tpu.memory_space<vmem>>, vector<1x128xf32>
    %21 = vector.broadcast %20 : vector<1x128xf32> to vector<8x128xf32>
    %22 = arith.addf %19, %21 : vector<8x128xf32>
    %cst_8 = arith.constant 0.000000e+00 : f32
    %23 = vector.broadcast %cst_8 : f32 to vector<8x128xf32>
    %24 = arith.maximumf %22, %23 : vector<8x128xf32>
    %c0_9 = arith.constant 0 : index
    %c0_10 = arith.constant 0 : index
    %25 = vector.load %arg4[%c0_9, %c0_10] : memref<128x128xf32, #tpu.memory_space<vmem>>, vector<128x128xf32>
    %cst_11 = arith.constant dense<0.000000e+00> : vector<8x128xf32>
    %26 = tpu.matmul %24, %25, %cst_11 {dimension_numbers = #tpu.dot_dimension_numbers<[1], [0], [0], [1], [0, 0, 1, 1], [], []>} : vector<8x128xf32>, vector<128x128xf32>, vector<8x128xf32> -> vector<8x128xf32>
    %c0_12 = arith.constant 0 : index
    %c0_13 = arith.constant 0 : index
    %27 = vector.load %arg5[%c0_12, %c0_13] : memref<1x128xf32, #tpu.memory_space<vmem>>, vector<1x128xf32>
    %28 = vector.broadcast %27 : vector<1x128xf32> to vector<8x128xf32>
    %29 = arith.addf %26, %28 : vector<8x128xf32>
    %c0_14 = arith.constant 0 : index
    %c0_15 = arith.constant 0 : index
    %30 = vector.load %arg6[%c0_14, %c0_15] : memref<8x128xf32, #tpu.memory_space<vmem>>, vector<8x128xf32>
    tpu.vector_store %arg6[%c0_14, %c0_15], %29 {strides = array<i32>} : memref<8x128xf32, #tpu.memory_space<vmem>>, vector<8x128xf32>,
    return
  }
  func.func @transform_0(%arg0: i32) -> (i32, i32) {
    %c0_i32 = arith.constant 0 : i32
    %c0_i32_0 = arith.constant 0 : i32
    return %arg0, %c0_i32 : i32, i32
  }
  func.func @transform_1(%arg0: i32) -> (i32, i32) {
    %c0_i32 = arith.constant 0 : i32
    %c0_i32_0 = arith.constant 0 : i32
    %c0_i32_1 = arith.constant 0 : i32
    return %c0_i32, %c0_i32_0 : i32, i32
  }
  func.func @transform_2(%arg0: i32) -> (i32, i32) {
    %c0_i32 = arith.constant 0 : i32
    %c0_i32_0 = arith.constant 0 : i32
    %c0_i32_1 = arith.constant 0 : i32
    return %c0_i32, %c0_i32_0 : i32, i32
  }
  func.func @transform_3(%arg0: i32) -> (i32, i32) {
    %c0_i32 = arith.constant 0 : i32
    %c0_i32_0 = arith.constant 0 : i32
    %c0_i32_1 = arith.constant 0 : i32
    return %c0_i32, %c0_i32_0 : i32, i32
  }
  func.func @transform_4(%arg0: i32) -> (i32, i32) {
    %c0_i32 = arith.constant 0 : i32
    %c0_i32_0 = arith.constant 0 : i32
    %c0_i32_1 = arith.constant 0 : i32
    return %c0_i32, %c0_i32_0 : i32, i32
  }
  func.func @transform_5(%arg0: i32) -> (i32, i32) {
    %c0_i32 = arith.constant 0 : i32
    %c0_i32_0 = arith.constant 0 : i32
    return %arg0, %c0_i32 : i32, i32
  }
}

</mosaic_0001>

<bundles_post_ra>
// kernel: tpu_custom_call.1
= control target key start
LH: loop header
LB: loop body
LE: loop exit
PB: predicated region body
PF: predicated region fallthrough
CT: control target
= control target key end

     0   :  { %10 = vsyncpa [#allocation3], 0  ;;  %s627_s0 = inlined_call_operand.vmem [shape: s32[8,4], index: 0, kind: input, shape index: {}]   ;;  %s628_s1 = inlined_call_operand.hbm [shape: f32[128,128], index: 1, kind: input, shape index: {}]   ;;  %s629_s2 = inlined_call_operand.vmem [shape: f32[1,128], index: 2, kind: input, shape index: {}]   ;;  %s630_s3 = inlined_call_operand.hbm [shape: f32[128,128], index: 3, kind: input, shape index: {}]   ;;  %s631_s4 = inlined_call_operand.vmem [shape: f32[1,128], index: 4, kind: input, shape index: {}]   ;;  %s632_s5 = inlined_call_operand.hbm [shape: f32[8,128], index: 5, kind: output, shape index: {}]  }
   0x1   :  { %11 = vsyncpa [#allocation6], 0 }
   0x2   :  { %12 = vsyncpa [#allocation4], 0  ;;  %s523_s18 = smov [#allocation2]   ;;  %s451_s22 = scalar_lea.hbm %s628_s1, 2048 }
   0x3   :  { %s20_s19 = sshll.u32 %s523_s18, 4  ;;  %p452_p0 = scmp.ne.s32.totalorder %s628_s1, %s451_s22  ;;  %s21_s19 = int_to_ptr.vmem [resolvable:$true] %s20_s19 }
   0x4   :  { %p455_p1 = scmp.lt.u32.totalorder %s451_s22, %s628_s1 }
   0x6   :  { %p457_p2 = pnand %p455_p1, %p452_p0 }
   0x8   :  { %460 = shalt.err (!%p457_p2)
}
   0x9   :  { %s461_s27 = scalar_lea.vmem %s21_s19, 2048  ;;  %p466_p4 = scmp.lt.s32.totalorder %s21_s19, %s21_s19 }
   0xa   :  { %p462_p3 = scmp.ne.s32.totalorder %s21_s19, %s461_s27  ;;  %p467_p5 = scmp.lt.s32.totalorder %s461_s27, %s461_s27 }
   0xc   :  { %p468_p6 = por %p467_p5, %p466_p4 }
   0xe   :  { %p469_p7 = pnand %p468_p6, %p462_p3 }
  0x10   :  { %472 = shalt.err (!%p469_p7)
}
  0x11   :  { %s524_s28 = smov 128   ;;  %s525_s29 = smov 8  }
  0x12   :  { %26 = dma.hbm_to_vmem [thread:$0]  %s628_s1, 2048, %s21_s19, [#allocation3], %s524_s28, %s524_s28, %s525_s29  }
  0x13   :  { %s526_s7 = smov [#allocation5]   ;;  %s473_s11 = scalar_lea.hbm %s630_s3, 2048 }
  0x14   :  { %s34_s8 = sshll.u32 %s526_s7, 4  ;;  %p474_p8 = scmp.ne.s32.totalorder %s630_s3, %s473_s11  ;;  %s35_s8 = int_to_ptr.vmem [resolvable:$true] %s34_s8 }
  0x15   :  { %p477_p9 = scmp.lt.u32.totalorder %s473_s11, %s630_s3 }
  0x17   :  { %p479_p10 = pnand %p477_p9, %p474_p8 }
  0x19   :  { %482 = shalt.err (!%p479_p10)
}
  0x1a   :  { %s483_s16 = scalar_lea.vmem %s35_s8, 2048  ;;  %p488_p12 = scmp.lt.s32.totalorder %s35_s8, %s35_s8 }
  0x1b   :  { %p484_p11 = scmp.ne.s32.totalorder %s35_s8, %s483_s16  ;;  %p489_p13 = scmp.lt.s32.totalorder %s483_s16, %s483_s16 }
  0x1d   :  { %p490_p0 = por %p489_p13, %p488_p12 }
  0x1f   :  { %p491_p1 = pnand %p490_p0, %p484_p11 }
  0x21   :  { %494 = shalt.err (!%p491_p1)
}
  0x22   :  { %40 = dma.hbm_to_vmem [thread:$0]  %s630_s3, 2048, %s35_s8, [#allocation6], %s524_s28, %s524_s28, %s525_s29  }
  0x23   :  { %517 = dma.done.wait [#allocation3], 2048  }
  0x24   :  { %518 = vsyncadd [#allocation3], 4294965248 }
  0x25   :  { %519 = dma.done.wait [#allocation6], 2048  }
  0x26   :  { %520 = vsyncadd [#allocation6], 4294965248  ;;  %v527_v0 = vmov 0   ;;  %v528_v1 = vmov 2   ;;  %v529_v2 = vmov 0.0|0.0   ;;  %v51_v3 = vld [vmem:[%s627_s0] sm:$0xff]  ;;  %v49_v52 = vlaneseq }
  0x27   :  { %446 = vset.pattern.permute.xlu0 %v527_v0  ;;  %448 = vset.pattern.permute.xlu1 %v528_v1  ;;  %v73_v4 = vld [vmem:[#allocation2] sm:$0xff]  ;;  %v74_v5 = vld [vmem:[#allocation2 + $0x8] sm:$0xff]  ;;  %v75_v7 = vld [vmem:[#allocation2 + $0x10] sm:$0xff]  ;;  %v530_v12 = vmov 1   ;;  %v531_v13 = vmov 3   ;;  %vm532_vm0 = vmmov 0  }
  0x28   :  { %385 = vmatprep.subr.bf16.mxu0 %v529_v2  ;;  %409 = vmatprep.subr.bf16.mxu1 %v529_v2  ;;  %v386_v6 = vpack.c.bf16 %v74_v5, %v73_v4  ;;  %v76_v8 = vld [vmem:[#allocation2 + $0x18] sm:$0xff]  ;;  %v77_v10 = vld [vmem:[#allocation2 + $0x20] sm:$0xff]  ;;  %v78_v11 = vld [vmem:[#allocation2 + $0x28] sm:$0xff]  ;;  %v533_v17 = vmov 0.0   ;;  %v50_v55 = vand.u32 127, %v49_v52  ;;  %v534_v58 = vmov 1.0  }
  0x29   :  { %53 = vperm.xlu0 %446, %v51_v3   ;;  %62 = vperm.xlu1 %448, %v51_v3   ;;  %v389_v9 = vpack.c.bf16 %v76_v8, %v75_v7  ;;  %v392_v14 = vpack.c.bf16 %v78_v11, %v77_v10  ;;  %v79_v15 = vld [vmem:[#allocation2 + $0x30] sm:$0xff]  ;;  %v80_v16 = vld [vmem:[#allocation2 + $0x38] sm:$0xff]  ;;  %v167_v18 = vld [vmem:[#allocation5] sm:$0xff]  ;;  %s535_s22 = smov [#allocation7]  }
  0x2a   :  { %387 = vmatpush3.bf16.msra.mxu0 %v386_v6  ;;  %347 = vmatprep.mubr.msk.f32.mxu0 %vm532_vm0, %v533_v17  ;;  %v168_v19 = vld [vmem:[#allocation5 + $0x8] sm:$0xff]  ;;  %v169_v20 = vld [vmem:[#allocation5 + $0x10] sm:$0xff]  ;;  %v395_v21 = vpack.c.bf16 %v80_v16, %v79_v15  ;;  %v170_v23 = vld [vmem:[#allocation5 + $0x18] sm:$0xff]  ;;  %s267_s23 = sshll.u32 %s535_s22, 4  ;;  %s268_s23 = int_to_ptr.vmem [resolvable:$true] %s267_s23 }
  0x2b   :  { %388 = vmatprep.subr.bf16.mxu0 %v529_v2  ;;  %382 = vmatprep.mubr.msk.f32.mxu1 %vm532_vm0, %v533_v17  ;;  %v410_v22 = vpack.c.bf16 %v168_v19, %v167_v18  ;;  %v81_v24 = vld [vmem:[#allocation2 + $0x40] sm:$0xff]  ;;  %v82_v25 = vld [vmem:[#allocation2 + $0x48] sm:$0xff]  ;;  %v413_v26 = vpack.c.bf16 %v170_v23, %v169_v20  ;;  %v83_v30 = vld [vmem:[#allocation2 + $0x50] sm:$0xff]  ;;  %s495_s24 = scalar_lea.vmem %s268_s23, 128  ;;  %p500_p3 = scmp.lt.s32.totalorder %s268_s23, %s268_s23 }
  0x2c   :  { %v171_v27 = vld [vmem:[#allocation5 + $0x20] sm:$0xff]  ;;  %v172_v28 = vld [vmem:[#allocation5 + $0x28] sm:$0xff]  ;;  %v398_v29 = vpack.c.bf16 %v82_v25, %v81_v24  ;;  %v84_v31 = vld [vmem:[#allocation2 + $0x58] sm:$0xff]  ;;  %p496_p2 = scmp.ne.s32.totalorder %s268_s23, %s495_s24  ;;  %p501_p4 = scmp.lt.s32.totalorder %s495_s24, %s495_s24 }
  0x2d   :  { %447 = vset.pattern.permute.xlu0 %v530_v12  ;;  %449 = vset.pattern.permute.xlu1 %v531_v13  ;;  %v416_v32 = vpack.c.bf16 %v172_v28, %v171_v27  ;;  %v173_v33 = vld [vmem:[#allocation5 + $0x30] sm:$0xff]  ;;  %v174_v34 = vld [vmem:[#allocation5 + $0x38] sm:$0xff]  ;;  %v401_v35 = vpack.c.bf16 %v84_v31, %v83_v30  ;;  %v85_v36 = vld [vmem:[#allocation2 + $0x60] sm:$0xff] }
  0x2e   :  { %57 = vperm.xlu0 %447, %v51_v3   ;;  %67 = vperm.xlu1 %449, %v51_v3   ;;  %v86_v37 = vld [vmem:[#allocation2 + $0x68] sm:$0xff]  ;;  %v419_v38 = vpack.c.bf16 %v174_v34, %v173_v33  ;;  %v175_v39 = vld [vmem:[#allocation5 + $0x40] sm:$0xff]  ;;  %v87_v42 = vld [vmem:[#allocation2 + $0x70] sm:$0xff]  ;;  %p502_p5 = por %p501_p4, %p500_p3 }
  0x2f   :  { %390 = vmatpush3.bf16.msra.mxu0 %v389_v9  ;;  %411 = vmatpush3.bf16.msra.mxu1 %v410_v22  ;;  %v176_v40 = vld [vmem:[#allocation5 + $0x48] sm:$0xff]  ;;  %v404_v41 = vpack.c.bf16 %v86_v37, %v85_v36  ;;  %v88_v43 = vld [vmem:[#allocation2 + $0x78] sm:$0xff]  ;;  %v177_v45 = vld [vmem:[#allocation5 + $0x50] sm:$0xff] }
  0x30   :  { %391 = vmatprep.subr.bf16.mxu0 %v529_v2  ;;  %412 = vmatprep.subr.bf16.mxu1 %v529_v2  ;;  %v422_v44 = vpack.c.bf16 %v176_v40, %v175_v39  ;;  %v178_v46 = vld [vmem:[#allocation5 + $0x58] sm:$0xff]  ;;  %v407_v47 = vpack.c.bf16 %v88_v43, %v87_v42  ;;  %v179_v49 = vld [vmem:[#allocation5 + $0x60] sm:$0xff]  ;;  %v180_v50 = vld [vmem:[#allocation5 + $0x68] sm:$0xff]  ;;  %p503_p6 = pnand %p502_p5, %p496_p2 }
  0x31   :  { %v425_v48 = vpack.c.bf16 %v178_v46, %v177_v45  ;;  %v428_v51 = vpack.c.bf16 %v180_v50, %v179_v49  ;;  %v181_v59 = vld [vmem:[#allocation5 + $0x70] sm:$0xff]  ;;  %v182_v60 = vld [vmem:[#allocation5 + $0x78] sm:$0xff]  ;;  %v278_v62 = vld [vmem:[%s629_s2] ss:$0 sm:$0xff] }
  0x32   :  { %450 = vset.pattern.permute.xlu0 %v531_v13  ;;  %v431_v61 = vpack.c.bf16 %v182_v60, %v181_v59  ;;  %v280_v3 = vld [vmem:[%s631_s4] ss:$0 sm:$0xff] }
  0x33   :  { %393 = vmatpush3.bf16.msra.mxu0 %v392_v14  ;;  %414 = vmatpush3.bf16.msra.mxu1 %v413_v26 }
  0x34   :  { %394 = vmatprep.subr.bf16.mxu0 %v529_v2  ;;  %415 = vmatprep.subr.bf16.mxu1 %v529_v2 }
  0x37   :  { %396 = vmatpush3.bf16.msra.mxu0 %v395_v21  ;;  %417 = vmatpush3.bf16.msra.mxu1 %v416_v32 }
  0x38   :  { %397 = vmatprep.subr.bf16.mxu0 %v529_v2  ;;  %418 = vmatprep.subr.bf16.mxu1 %v529_v2 }
  0x3b   :  { %399 = vmatpush3.bf16.msra.mxu0 %v398_v29  ;;  %420 = vmatpush3.bf16.msra.mxu1 %v419_v38 }
  0x3c   :  { %400 = vmatprep.subr.bf16.mxu0 %v529_v2  ;;  %421 = vmatprep.subr.bf16.mxu1 %v529_v2 }
  0x3f   :  { %402 = vmatpush3.bf16.msra.mxu0 %v401_v35  ;;  %423 = vmatpush3.bf16.msra.mxu1 %v422_v44 }
  0x40   :  { %403 = vmatprep.subr.bf16.mxu0 %v529_v2  ;;  %424 = vmatprep.subr.bf16.mxu1 %v529_v2 }
  0x43   :  { %405 = vmatpush3.bf16.msra.mxu0 %v404_v41  ;;  %426 = vmatpush3.bf16.msra.mxu1 %v425_v48 }
  0x44   :  { %406 = vmatprep.subr.bf16.mxu0 %v529_v2  ;;  %427 = vmatprep.subr.bf16.mxu1 %v529_v2 }
  0x47   :  { %408 = vmatpush3.bf16.msra.mxu0 %v407_v47  ;;  %429 = vmatpush3.bf16.msra.mxu1 %v428_v51 }
  0x48   :  { %430 = vmatprep.subr.bf16.mxu1 %v529_v2 }
  0x4b   :  { %432 = vmatpush3.bf16.msra.mxu1 %v431_v61 }
  0xa8   :  { %v54_v53 = vpop.permute.xlu0 %53  ;;  %v63_v54 = vpop.permute.xlu1 %62 }
  0xa9   :  { %vm55_vm1 = vcmp.eq.s32.totalorder %v50_v55, %v54_v53  ;;  %vm64_vm4 = vcmp.eq.s32.totalorder %v50_v55, %v63_v54 }
  0xad   :  { %v58_v56 = vpop.permute.xlu0 %57  ;;  %v68_v57 = vpop.permute.xlu1 %67 }
  0xae   :  { %vm59_vm2 = vcmp.eq.s32.totalorder %v50_v55, %v58_v56  ;;  %vm69_vm3 = vcmp.eq.s32.totalorder %v50_v55, %v68_v57 }
  0xaf   :  { %vm60_vm5 = vmor %vm55_vm1, %vm59_vm2 }
  0xb0   :  { %vm65_vm6 = vmor %vm60_vm5, %vm64_vm4 }
  0xb1   :  { %vm70_vm7 = vmor %vm65_vm6, %vm69_vm3 }
  0xb2   :  { %348 = vmatmul.mubr.msk.f32.vlgmr.msra.gmra.mrb[0].mxu0 %vm70_vm7, %v534_v58 }
 0x185   :  { %v162_v63 = vpop.f32.mrb[0].mxu0 }
 0x186   :  { %v163_v0 = vadd.f32 %v278_v62, %v162_v63  ;;  %v349_v1 = vpop.f32.mrb[1].mxu0 }
 0x188   :  { %v166_v2 = vmax.f32 %v163_v0, 0.0 }
 0x18a   :  { %383 = vmatmul.mubr.f32.vlgmr.msra.gmra.mrb[0].mxu1 %v166_v2 }
 0x25d   :  { %v256_v4 = vpop.f32.mrb[0].mxu1 }
 0x25e   :  { %v257_v5 = vadd.f32 %v280_v3, %v256_v4  ;;  %v384_v6 = vpop.f32.mrb[1].mxu1 }
 0x260   :  { %260 = vst [vmem:[#allocation7] sm:$0xff] %v257_v5 }
 0x261   :  { %506 = shalt.err (!%p503_p6)
}
 0x262   :  { %s507_s26 = scalar_lea.hbm %s632_s5, 128 }
 0x263   :  { %p508_p7 = scmp.ne.s32.totalorder %s632_s5, %s507_s26  ;;  %p511_p8 = scmp.lt.u32.totalorder %s507_s26, %s632_s5 }
 0x265   :  { %p513_p9 = pnand %p511_p8, %p508_p7 }
 0x267   :  { %516 = shalt.err (!%p513_p9)
}
 0x268   :  { %270 = dma.vmem_to_hbm [thread:$0]  %s268_s23, 128, %s632_s5, [#allocation4]  }
 0x269   :  { %521 = dma.done.wait [#allocation4], 128  }
 0x26a   :  { %522 = vsyncadd [#allocation4], 4294967168 }
 0x26b   :  { %274 = vsyncpa [#allocation3], 1 }
 0x26c   :  { %275 = vsyncpa [#allocation6], 1 }
 0x26d   :  { %276 = vsyncpa [#allocation4], 1 }

</bundles_post_ra>
